<compile_context>
chip_gen: v7x
topology: tpu7x:2x2x1
jax: 0.10.0
libtpu: 0.0.40
codegen_flags: <defaults>
</compile_context>

<pallas_src>
import jax
import jax.numpy as jnp
from jax.experimental import pallas as pl
from jax.experimental.pallas import tpu as pltpu


EPS = 1e-5  # nn.LayerNorm default


def _ln_connection_kernel(x_ref, sub_ref, gamma_ref, beta_ref, o_ref):
    # Residual add + LayerNorm over the last dim, one-pass statistics in f32.
    added = x_ref[...].astype(jnp.float32) + sub_ref[...].astype(jnp.float32)
    inv_d = jnp.float32(1.0 / added.shape[-1])

    s = jnp.sum(added, axis=-1, keepdims=True)
    s2 = jnp.sum(added * added, axis=-1, keepdims=True)
    mean = s * inv_d
    var = jnp.maximum(s2 * inv_d - mean * mean, 0.0)   # biased var, clamp cancellation
    inv_std = jax.lax.rsqrt(var + EPS)                 # EUP rsqrt (free slot)

    # gamma/beta arrive as f32 (1, D) -> broadcast over rows.
    o_ref[...] = ((added - mean) * inv_std * gamma_ref[...]
                  + beta_ref[...]).astype(o_ref.dtype)


def _tpu_params():
    """(vmem_capacity_bytes, min_grid_steps) with safe fallbacks."""
    vmem_cap = 64 * 1024 * 1024          # conservative default (v7x per-TC)
    try:
        info = pltpu.get_tpu_info()
        cap = getattr(info, "vmem_capacity_bytes", None)
        if cap:
            vmem_cap = int(cap)
    except Exception:
        pass
    kind = ""
    try:
        kind = jax.devices()[0].device_kind.lower()
    except Exception:
        pass
    is_v7 = "v7" in kind
    # Megacore (2 TCs) only on v7x; on v5e/v6e the grid is a serial loop,
    # so don't fragment work just to keep the step count up.
    min_grid_steps = 8 if is_v7 else 2
    return vmem_cap, min_grid_steps


def _choose_row_tile(rows, d_model, itemsize, target_block_bytes, min_grid_steps):
    """Sublane-aligned row tile: ~target_block_bytes per input block, keeping
    >= min_grid_steps grid iterations, and never exceeding the row count."""
    if rows <= 8:
        return int(rows)                                # single full-extent block
    bytes_per_row = max(1, d_model * itemsize)
    tile = target_block_bytes // bytes_per_row
    tile = min(tile, pl.cdiv(rows, min_grid_steps))     # keep the grid populated
    tile = max(8, (tile // 8) * 8)                      # sublane (8) alignment
    tile = min(tile, (rows // 8) * 8)                   # never larger than the data
    return int(tile)


def layer_norm_connection(x, sub_layer, gamma, beta, *, row_tile=None):
    """x, sub_layer: (B, S, D); gamma, beta: (D,). Returns (B, S, D)."""
    B, S, D = x.shape
    rows = B * S
    itemsize = jnp.dtype(x.dtype).itemsize

    vmem_cap, min_grid_steps = _tpu_params()
    if row_tile is None:
        target_block_bytes = max(1 << 20, vmem_cap // 12)  # ~5 MiB v7x, ~10 MiB v5e/v6e
        row_tile = _choose_row_tile(rows, D, itemsize,
                                    target_block_bytes, min_grid_steps)

    x2 = x.reshape(rows, D)
    s2 = sub_layer.reshape(rows, D)
    g2 = gamma.astype(jnp.float32).reshape(1, D)   # cast once on host side
    b2 = beta.astype(jnp.float32).reshape(1, D)

    grid = (pl.cdiv(rows, row_tile),)              # ragged last block masked by Pallas

    # VMEM budget: (x, sub, out) double-buffered blocks + f32 upcast temporaries
    # + resident gamma/beta + small slack, clamped to 90% of physical VMEM.
    block_bytes = row_tile * D * itemsize
    f32_block = row_tile * D * 4
    vmem_bytes = 3 * 2 * block_bytes + 2 * f32_block + 2 * D * 4 + (2 << 20)
    vmem_bytes = int(min(vmem_bytes, int(0.9 * vmem_cap)))
    vmem_bytes = max(vmem_bytes, 8 << 20)

    # TODO(synk): for d_model < 128 (lane-sparse blocks), repack rows into the
    # lane axis to avoid masked partial stores; not done here since production
    # d_model is typically >= 512.

    out = pl.pallas_call(
        _ln_connection_kernel,
        out_shape=jax.ShapeDtypeStruct((rows, D), x.dtype),
        grid_spec=pltpu.PrefetchScalarGridSpec(
            num_scalar_prefetch=0,
            grid=grid,
            in_specs=[
                pl.BlockSpec((row_tile, D), lambda i: (i, 0)),  # x rows
                pl.BlockSpec((row_tile, D), lambda i: (i, 0)),  # sub_layer rows
                pl.BlockSpec((1, D), lambda i: (0, 0)),          # gamma (resident)
                pl.BlockSpec((1, D), lambda i: (0, 0)),          # beta  (resident)
            ],
            out_specs=pl.BlockSpec((row_tile, D), lambda i: (i, 0)),
        ),
        compiler_params=pltpu.CompilerParams(
            dimension_semantics=("parallel",),
            vmem_limit_bytes=vmem_bytes,
        ),
    )(x2, s2, g2, b2)

    return out.reshape(B, S, D)


def _reference(x, sub_layer, gamma, beta):
    added = (x + sub_layer).astype(jnp.float32)
    mean = jnp.mean(added, axis=-1, keepdims=True)
    var = jnp.mean((added - mean) ** 2, axis=-1, keepdims=True)
    return ((added - mean) / jnp.sqrt(var + EPS)) * gamma + beta


if __name__ == "__main__":
    B, S, D = 2, 8, 32  # batch=2, seq=8, d_model=32

    key = jax.random.PRNGKey(0)
    kx, ks = jax.random.split(key)
    x = jax.random.normal(kx, (B, S, D), dtype=jnp.float32)
    sub = jax.random.normal(ks, (B, S, D), dtype=jnp.float32)

    # nn.LayerNorm(d_model) init: weight=1, bias=0 (deterministic)
    gamma = jnp.ones((D,), dtype=jnp.float32)
    beta = jnp.zeros((D,), dtype=jnp.float32)

    out = layer_norm_connection(x, sub, gamma, beta)
    out = jax.block_until_ready(out)

    ref = _reference(x, sub, gamma, beta)
    assert out.shape == (B, S, D)
    assert jnp.allclose(out, ref.astype(out.dtype), atol=1e-5, rtol=1e-5), \
        "mismatch vs reference"

    print("KERNEL_OK")
</pallas_src>

<mosaic_0001>
module attributes {stable_mosaic.version = 11 : i64} {
  func.func @_ln_connection_kernel(%arg0: i32, %arg1: memref<8x32xf32, #tpu.memory_space<vmem>>, %arg2: memref<8x32xf32, #tpu.memory_space<vmem>>, %arg3: memref<1x32xf32, #tpu.memory_space<vmem>>, %arg4: memref<1x32xf32, #tpu.memory_space<vmem>>, %arg5: memref<8x32xf32, #tpu.memory_space<vmem>>) attributes {dimension_semantics = [#tpu.dimension_semantics<parallel>], iteration_bounds = array<i64: 2>, scalar_prefetch = 0 : i64, scratch_operands = 0 : i64, tpu.core_type = #tpu.core_type<tc>, window_params = [{transform_indices = @transform_0, window_bounds = array<i64: 8, 32>}, {transform_indices = @transform_1, window_bounds = array<i64: 8, 32>}, {pipeline_mode = #tpu.pipeline_mode<synchronous>, transform_indices = @transform_2, window_bounds = array<i64: 1, 32>}, {pipeline_mode = #tpu.pipeline_mode<synchronous>, transform_indices = @transform_3, window_bounds = array<i64: 1, 32>}, {transform_indices = @transform_4, window_bounds = array<i64: 8, 32>}]} {
    %c0 = arith.constant 0 : index
    %c0_0 = arith.constant 0 : index
    %0 = vector.load %arg1[%c0, %c0_0] : memref<8x32xf32, #tpu.memory_space<vmem>>, vector<8x32xf32>
    %c0_1 = arith.constant 0 : index
    %c0_2 = arith.constant 0 : index
    %1 = vector.load %arg2[%c0_1, %c0_2] : memref<8x32xf32, #tpu.memory_space<vmem>>, vector<8x32xf32>
    %2 = arith.addf %0, %1 : vector<8x32xf32>
    %cst = arith.constant dense<0.000000e+00> : vector<8xf32>
    %3 = vector.multi_reduction <add>, %2, %cst [1] : vector<8x32xf32> to vector<8xf32>
    %4 = vector.shape_cast %3 : vector<8xf32> to vector<8x1xf32>
    %5 = arith.mulf %2, %2 : vector<8x32xf32>
    %cst_3 = arith.constant dense<0.000000e+00> : vector<8xf32>
    %6 = vector.multi_reduction <add>, %5, %cst_3 [1] : vector<8x32xf32> to vector<8xf32>
    %7 = vector.shape_cast %6 : vector<8xf32> to vector<8x1xf32>
    %cst_4 = arith.constant 3.125000e-02 : f32
    %8 = vector.broadcast %cst_4 : f32 to vector<8x1xf32>
    %9 = arith.mulf %4, %8 : vector<8x1xf32>
    %cst_5 = arith.constant 3.125000e-02 : f32
    %10 = vector.broadcast %cst_5 : f32 to vector<8x1xf32>
    %11 = arith.mulf %7, %10 : vector<8x1xf32>
    %12 = arith.mulf %9, %9 : vector<8x1xf32>
    %13 = arith.subf %11, %12 : vector<8x1xf32>
    %cst_6 = arith.constant 0.000000e+00 : f32
    %14 = vector.broadcast %cst_6 : f32 to vector<8x1xf32>
    %15 = arith.maximumf %13, %14 : vector<8x1xf32>
    %cst_7 = arith.constant 9.99999974E-6 : f32
    %16 = vector.broadcast %cst_7 : f32 to vector<8x1xf32>
    %17 = arith.addf %15, %16 : vector<8x1xf32>
    %18 = math.rsqrt %17 : vector<8x1xf32>
    %19 = vector.broadcast %9 : vector<8x1xf32> to vector<8x32xf32>
    %20 = arith.subf %2, %19 : vector<8x32xf32>
    %21 = vector.broadcast %18 : vector<8x1xf32> to vector<8x32xf32>
    %22 = arith.mulf %20, %21 : vector<8x32xf32>
    %c0_8 = arith.constant 0 : index
    %c0_9 = arith.constant 0 : index
    %23 = vector.load %arg3[%c0_8, %c0_9] : memref<1x32xf32, #tpu.memory_space<vmem>>, vector<1x32xf32>
    %24 = vector.broadcast %23 : vector<1x32xf32> to vector<8x32xf32>
    %25 = arith.mulf %22, %24 : vector<8x32xf32>
    %c0_10 = arith.constant 0 : index
    %c0_11 = arith.constant 0 : index
    %26 = vector.load %arg4[%c0_10, %c0_11] : memref<1x32xf32, #tpu.memory_space<vmem>>, vector<1x32xf32>
    %27 = vector.broadcast %26 : vector<1x32xf32> to vector<8x32xf32>
    %28 = arith.addf %25, %27 : vector<8x32xf32>
    %c0_12 = arith.constant 0 : index
    %c0_13 = arith.constant 0 : index
    %29 = vector.load %arg5[%c0_12, %c0_13] : memref<8x32xf32, #tpu.memory_space<vmem>>, vector<8x32xf32>
    tpu.vector_store %arg5[%c0_12, %c0_13], %28 {strides = array<i32>} : memref<8x32xf32, #tpu.memory_space<vmem>>, vector<8x32xf32>,
    return
  }
  func.func @transform_0(%arg0: i32) -> (i32, i32) {
    %c0_i32 = arith.constant 0 : i32
    %c0_i32_0 = arith.constant 0 : i32
    return %arg0, %c0_i32 : i32, i32
  }
  func.func @transform_1(%arg0: i32) -> (i32, i32) {
    %c0_i32 = arith.constant 0 : i32
    %c0_i32_0 = arith.constant 0 : i32
    return %arg0, %c0_i32 : i32, i32
  }
  func.func @transform_2(%arg0: i32) -> (i32, i32) {
    %c0_i32 = arith.constant 0 : i32
    %c0_i32_0 = arith.constant 0 : i32
    %c0_i32_1 = arith.constant 0 : i32
    return %c0_i32, %c0_i32_0 : i32, i32
  }
  func.func @transform_3(%arg0: i32) -> (i32, i32) {
    %c0_i32 = arith.constant 0 : i32
    %c0_i32_0 = arith.constant 0 : i32
    %c0_i32_1 = arith.constant 0 : i32
    return %c0_i32, %c0_i32_0 : i32, i32
  }
  func.func @transform_4(%arg0: i32) -> (i32, i32) {
    %c0_i32 = arith.constant 0 : i32
    %c0_i32_0 = arith.constant 0 : i32
    return %arg0, %c0_i32 : i32, i32
  }
}

</mosaic_0001>

<bundles_post_ra>
// kernel: tpu_custom_call.1
= control target key start
LH: loop header
LB: loop body
LE: loop exit
PB: predicated region body
PF: predicated region fallthrough
CT: control target
= control target key end

     0   :  { %9 = vsyncpa [#allocation3], 0  ;;  %s847_s0 = inlined_call_operand.hbm [shape: f32[16,32], index: 0, kind: input, shape index: {}]   ;;  %s848_s1 = inlined_call_operand.hbm [shape: f32[16,32], index: 1, kind: input, shape index: {}]   ;;  %s849_s2 = inlined_call_operand.vmem [shape: f32[1,32], index: 2, kind: input, shape index: {}]   ;;  %s850_s3 = inlined_call_operand.vmem [shape: f32[1,32], index: 3, kind: input, shape index: {}]   ;;  %s851_s4 = inlined_call_operand.hbm [shape: f32[16,32], index: 4, kind: output, shape index: {}]  }
   0x1   :  { %11 = vsyncpa [#allocation3 + $0x1], 0 }
   0x2   :  { %12 = vsyncpa [#allocation6], 0 }
   0x3   :  { %14 = vsyncpa [#allocation6 + $0x1], 0 }
   0x4   :  { %15 = vsyncpa [#allocation4], 0 }
   0x5   :  { %17 = vsyncpa [#allocation4 + $0x1], 0  ;;  %s624_s15 = smov 0   ;;  %s626_s16 = smov 0  }
   0x6   :  { %s628_s17 = smov 0   ;;  %s630_s18 = smov 0  }
   0x7 LB: > { %s645_s19 = sadd.s32 4294967295, %s594_s18   ;;  %s394_s20 = sadd.s32 4294967294, %s594_s18   ;;  %s594_s18 = sphi %s630_s18, %s870_s18   ;;  %s590_s17 = sphi %s628_s17, %s869_s17   ;;  %s586_s16 = sphi %s626_s16, %s868_s16   ;;  %s582_s15 = sphi %s624_s15, %s867_s15  }
   0x8   : > { %s649_s21 = sadd.s32 1, %s594_s18   ;;  %s30_s22 = sadd.s32 1, %s590_s17 }
   0x9   : > { %s27_s23 = ssub.s32 %s594_s18, %s649_s21  ;;  %p37_p0 = scmp.ne.s32.totalorder %s590_s17, %s586_s16 }
   0xa   : > { %p28_p1 = scmp.eq.s32.totalorder %s27_s23, 0  ;;  %p38_p2 = scmp.eq.s32.totalorder %s594_s18, 0 }
   0xb   : > { %p43_p3 = scmp.ne.s32.totalorder %s586_s16, %s582_s15  ;;  %p44_p4 = scmp.eq.s32.totalorder %s645_s19, 0 }
   0xc   : > { %s661_s24 = scalar_select %p28_p1, %s590_s17, %s30_s22  }
   0xd   : > { %p663_p5 = por %p38_p2, %p37_p0  ;;  %p667_p6 = por %p44_p4, %p43_p3 }
   0xe   : > { %p135_p7 = scmp.eq.s32.totalorder %s645_s19, 1  ;;  %p141_p8 = scmp.eq.s32.totalorder %s394_s20, 1 }
   0xf   : > { %s855_s26 = scalar_select %p667_p6, 1, 0 }
  0x10   : > { %p428_p10 = scmp.lt.s32.totalorder %s594_s18, 2  ;;  %p674_p11 = por %p135_p7, %p37_p0 }
  0x11   : > { %p678_p12 = por %p141_p8, %p43_p3  ;;  %s683_s29 = sand.u32 1, %s590_s17  }
  0x12   : > { %s856_s27 = scalar_select %p674_p11, 1, 0 }
  0x13   : > { %s857_s28 = scalar_select %p678_p12, 1, 0 }
  0x14   : > { %s398_s30 = sshll.u32 %s594_s18, 7  ;;  %s397_s5 = sshll.u32 %s683_s29, 3 }
  0x15   : > { %s692_s8 = scalar_lea.hbm %s847_s0, %s398_s30  ;;  %s171_s9 = scalar_lea.vmem [#allocation2], %s397_s5 }
  0x16   : > { %s178_s10 = sshll.u32 %s171_s9, 4  ;;  %p698_p13 = pnand %p428_p10, %p663_p5  ;;  %s702_s10 = int_to_ptr.vmem [resolvable:$true] %s178_s10 }
  0x17   : > { %s168_s12 = scalar_lea.sflag [#allocation3], %s683_s29  ;;  %s464_s13 = scalar_lea.hbm %s692_s8, 128 }
  0x18   : > { %p465_p2 = scmp.ne.s32.totalorder %s692_s8, %s464_s13  ;;  %p466_p3 = pneg %p698_p13 }
  0x19   : > { %s469_s22 = scalar_lea.hbm %s847_s0, 256  ;;  %p470_p5 = scmp.lt.u32.totalorder %s692_s8, %s847_s0 }
  0x1a   : > { %p467_p4 = pnand %p466_p3, %p465_p2  ;;  %p471_p8 = scmp.lt.u32.totalorder %s469_s22, %s464_s13 }
  0x1b   : > { %p473_p9 = scmp.lt.u32.totalorder %s464_s13, %s692_s8 }
  0x1c   : > { %p468_p7 = pneg %p467_p4  ;;  %p472_p10 = por %p471_p8, %p470_p5 }
  0x1e   : > { %p474_p0 = por %p473_p9, %p472_p10 }
  0x20   : > { %p475_p1 = pnand %p474_p0, %p468_p7 }
  0x22   : > { %478 = shalt.err (!%p475_p1)
}
  0x23   : > { %s479_s6 = scalar_lea.vmem %s702_s10, 128  ;;  %s596_s7 = smov [#allocation2]  }
  0x24   : > { %p480_p2 = scmp.ne.s32.totalorder %s702_s10, %s479_s6  ;;  %s484_s9 = sshll.u32 %s596_s7, 4  ;;  %s485_s9 = int_to_ptr.vmem [resolvable:$false] %s484_s9 }
  0x25   : > { %s486_s14 = scalar_lea.vmem %s485_s9, 256  ;;  %p487_p11 = scmp.lt.s32.totalorder %s702_s10, %s485_s9 }
  0x26   : > { %p482_p4 = pnand %p480_p2, %p466_p3  ;;  %p488_p5 = scmp.lt.s32.totalorder %s486_s14, %s479_s6 }
  0x28   : > { %p483_p12 = pneg %p482_p4  ;;  %p489_p8 = por %p488_p5, %p487_p11 }
  0x2a   : > { %p490_p9 = pnand %p489_p8, %p483_p12 }
  0x2c   : > { %493 = shalt.err (!%p490_p9)
}
  0x2d   : > { %420 = dma.hbm_to_vmem [thread:$0]  (!%p698_p13), %s692_s8, 128, %s702_s10, %s168_s12  }
  0x2e   : > { %p859_p0 = scmp.lt.s32.totalorder %s594_s18, 3  ;;  %p860_p1 = scmp.ge.s32.totalorder %s594_s18, 1 }
  0x2f   : > { %s745_s23 = scalar_lea.hbm %s848_s1, %s398_s30  ;;  %s189_s25 = scalar_lea.vmem [#allocation5], %s397_s5 }
  0x30   : > { %p736_p7 = pnand %p860_p1, %p859_p0  ;;  %s196_s6 = sshll.u32 %s189_s25, 4  ;;  %s197_s6 = int_to_ptr.vmem [resolvable:$true] %s196_s6 }
  0x31   : > { %s186_s8 = scalar_lea.sflag [#allocation6], %s683_s29  ;;  %s494_s10 = scalar_lea.hbm %s745_s23, 128 }
  0x32   : > { %s861_s13 = scalar_select %p736_p7, 1, 0 }
  0x33   : > { %p495_p11 = scmp.ne.s32.totalorder %s745_s23, %s494_s10  ;;  %s499_s30 = scalar_lea.hbm %s848_s1, 256 }
  0x34   : > { %p500_p2 = scmp.lt.u32.totalorder %s745_s23, %s848_s1  ;;  %p501_p4 = scmp.lt.u32.totalorder %s499_s30, %s494_s10 }
  0x35   : > { %p497_p12 = pnand %p495_p11, %p466_p3  ;;  %p503_p8 = scmp.lt.u32.totalorder %s494_s10, %s745_s23 }
  0x36   : > { %p502_p5 = por %p501_p4, %p500_p2 }
  0x37   : > { %p498_p10 = pneg %p497_p12 }
  0x38   : > { %p504_p9 = por %p503_p8, %p502_p5 }
  0x3a   : > { %p505_p0 = pnand %p504_p9, %p498_p10 }
  0x3c   : > { %508 = shalt.err (!%p505_p0)
}
  0x3d   : > { %s509_s29 = scalar_lea.vmem %s197_s6, 128  ;;  %s597_s5 = smov [#allocation5]  }
  0x3e   : > { %p510_p1 = scmp.ne.s32.totalorder %s197_s6, %s509_s29  ;;  %s514_s20 = sshll.u32 %s597_s5, 4  ;;  %s515_s20 = int_to_ptr.vmem [resolvable:$false] %s514_s20 }
  0x3f   : > { %s516_s22 = scalar_lea.vmem %s515_s20, 256  ;;  %p517_p6 = scmp.lt.s32.totalorder %s197_s6, %s515_s20 }
  0x40   : > { %p512_p11 = pnand %p510_p1, %p466_p3  ;;  %p518_p7 = scmp.lt.s32.totalorder %s516_s22, %s509_s29 }
  0x42   : > { %p513_p12 = pneg %p512_p11  ;;  %p519_p2 = por %p518_p7, %p517_p6 }
  0x44   : > { %p520_p4 = pnand %p519_p2, %p513_p12 }
  0x46   : > { %523 = shalt.err (!%p520_p4)
}
  0x47   : > { %423 = dma.hbm_to_vmem [thread:$0]  (!%p698_p13), %s745_s23, 128, %s197_s6, %s186_s8  }
  0x48   : > { %p862_p10 = scmp.ne.s32.totalorder %s861_s13, 0 }
  0x49   : > { %s772_s25 = sand.u32 (!%p862_p10), 1, %s586_s16   ;;  %p863_p6 = scmp.ne.s32.totalorder (!%p862_p10), %s855_s26, 0 }
  0x4a   : > { %205 = sbr.rel (%p862_p10) target bundleno = 273 (0x111), region = 36  ;;  %s775_s10 = sshll.u32 (!%p862_p10), %s772_s25, 3 }
  0x4b   : > { %s208_s12 = scalar_lea.sflag (!%p862_p10), [#allocation3], %s772_s25  ;;  %s211_s7 = scalar_lea.vmem (!%p862_p10), [#allocation2], %s775_s10 }
  0x51   : > { %569 = dma.done.wait (%p863_p6), %s208_s12, 128  }
  0x52   : > { %571 = vsyncadd (%p863_p6), %s208_s12, 4294967168  ;;  %s217_s11 = scalar_lea.sflag [#allocation6], %s772_s25  ;;  %s220_s13 = scalar_lea.vmem [#allocation5], %s775_s10 }
  0x53   : > { %573 = dma.done.wait (%p863_p6), %s217_s11, 128  }
  0x54   : > { %575 = vsyncadd (%p863_p6), %s217_s11, 4294967168  ;;  %v250_v0 = vld [vmem:[%s211_s7] sm:$0xff]  ;;  %v251_v1 = vld [vmem:[%s220_s13] sm:$0xff]  ;;  %vm253_vm0 = vcmask 261120   ;;  %s408_s30 = sshll.u32 %s645_s19, 7  ;;  %s249_s9 = scalar_lea.vmem [#allocation7], %s775_s10 }
  0x55   : > { %v252_v2 = vadd.f32 %v251_v1, %v250_v0  ;;  %v405_v16 = vld [vmem:[%s849_s2] ss:$0 sm:$0xff]  ;;  %s301_s14 = sshll.u32 %s249_s9, 4  ;;  %s802_s20 = scalar_lea.hbm %s851_s4, %s408_s30  ;;  %s804_s14 = int_to_ptr.vmem [resolvable:$true] %s301_s14 }
  0x56   : > { %v406_v18 = vld [vmem:[%s850_s3] ss:$0 sm:$0xff]  ;;  %s288_s22 = scalar_lea.sflag [#allocation4], %s772_s25  ;;  %s524_s12 = scalar_lea.vmem %s804_s14, 128 }
  0x57   : > { %v254_v3 = vsel %vm253_vm0, %v252_v2, 0.0  ;;  %v257_v4 = vmul.f32 %v252_v2, %v252_v2  ;;  %p525_p13 = scmp.ne.s32.totalorder %s804_s14, %s524_s12  ;;  %p864_p3 = scmp.ne.s32.totalorder %s856_s27, 0 }
  0x58   : > { %255 = vadd.xlane.f32.xlu0 %v254_v3  ;;  %s598_s19 = smov [#allocation7]  }
  0x59   : > { %v258_v5 = vsel %vm253_vm0, %v257_v4, 0.0  ;;  %p526_p7 = pnand %p525_p13, %p864_p3  ;;  %s528_s10 = sshll.u32 %s598_s19, 4  ;;  %s529_s10 = int_to_ptr.vmem [resolvable:$false] %s528_s10 }
  0x5a   : > { %s530_s7 = scalar_lea.vmem %s529_s10, 256  ;;  %p531_p8 = scmp.lt.s32.totalorder %s804_s14, %s529_s10 }
  0x5b   : > { %p527_p5 = pneg %p526_p7  ;;  %p532_p9 = scmp.lt.s32.totalorder %s530_s7, %s524_s12 }
  0x5c   : > { %259 = vadd.xlane.f32.xlu0 %v258_v5 }
  0x5d   : > { %p533_p0 = por %p532_p9, %p531_p8 }
  0x5f   : > { %p534_p1 = pnand %p533_p0, %p527_p5 }
  0xe5   : > { %v256_v6 = vpop.xlane.xlu0 %255 }
  0xe6   : > { %v261_v7 = vmul.f32 0.03125, %v256_v6 }
  0xe8   : > { %v263_v9 = vmul.f32 %v261_v7, %v261_v7  ;;  %v268_v14 = vsub.f32 %v252_v2, %v261_v7 }
  0xe9   : > { %v260_v8 = vpop.xlane.xlu0 %259 }
  0xea   : > { %v262_v10 = vmul.f32 0.03125, %v260_v8 }
  0xec   : > { %v264_v11 = vsub.f32 %v262_v10, %v263_v9 }
  0xee   : > { %v265_v12 = vmax.f32 %v264_v11, 0.0 }
  0xf0   : > { %v266_v13 = vadd.f32 1e-05, %v265_v12 }
  0xf2   : > { %462 = vrsqrt.f32 %v266_v13 }
  0xfc   : > { %v463_v15 = vpop.eup %462 }
  0xfd   : > { %v269_v17 = vmul.f32 %v463_v15, %v268_v14 }
  0xff   : > { %v277_v19 = vmul.f32 %v405_v16, %v269_v17 }
 0x101   : > { %v285_v20 = vadd.f32 %v406_v18, %v277_v19 }
 0x103   : > { %286 = vst.msk [vmem:[%s249_s9] sm:$0xff] %vm253_vm0, %v285_v20 }
 0x104   : > { %537 = shalt.err (!%p534_p1)
}
 0x105   : > { %s538_s25 = scalar_lea.hbm %s802_s20, 128  ;;  %s542_s26 = scalar_lea.hbm %s851_s4, 256 }
 0x106   : > { %p539_p11 = scmp.ne.s32.totalorder %s802_s20, %s538_s25  ;;  %p543_p4 = scmp.lt.u32.totalorder %s802_s20, %s851_s4 }
 0x107   : > { %p544_p10 = scmp.lt.u32.totalorder %s542_s26, %s538_s25  ;;  %p546_p13 = scmp.lt.u32.totalorder %s538_s25, %s802_s20 }
 0x108   : > { %p540_p12 = pnand %p539_p11, %p864_p3 }
 0x109   : > { %p545_p6 = por %p544_p10, %p543_p4 }
 0x10a   : > { %p541_p2 = pneg %p540_p12 }
 0x10b   : > { %p547_p7 = por %p546_p13, %p545_p6 }
 0x10d   : > { %p548_p5 = pnand %p547_p7, %p541_p2 }
 0x10f   : > { %551 = shalt.err (!%p548_p5)
}
 0x110   : > { %415 = dma.vmem_to_hbm [thread:$0]  (%p864_p3), %s804_s14, 128, %s802_s20, %s288_s22  }
 0x111 PF: > { %s313_s8 = sand.u32 1, %s582_s15   ;;  %p865_p8 = scmp.ne.s32.totalorder %s857_s28, 0 }
 0x112   : > { %p866_p9 = scmp.ge.s32.totalorder %s594_s18, 2  ;;  %s314_s30 = scalar_lea.sflag [#allocation4], %s313_s8 }
 0x114   : > { %p425_p0 = pnand %p866_p9, %p865_p8 }
 0x116   : > { %577 = dma.done.wait (!%p425_p0), %s314_s30, 128  }
 0x117   : > { %579 = vsyncadd (!%p425_p0), %s314_s30, 4294967168  ;;  %p20_p1 = scmp.ge.s32.totalorder %s649_s21, 4   ;;  %s867_s15 = smov %s586_s16 }
 0x118   : > { %s868_s16 = smov %s590_s17  ;;  %s869_s17 = smov %s661_s24 }
 0x119   : > { %s870_s18 = smov %s649_s21  ;;  %22 = sbr.rel (!%p20_p1) target bundleno = 7 (0x7), region = 94 }
 0x120   :  { %319 = vsyncpa [#allocation3], 1 }
 0x121   :  { %321 = vsyncpa [#allocation3 + $0x1], 1 }
 0x122   :  { %322 = vsyncpa [#allocation6], 1 }
 0x123   :  { %324 = vsyncpa [#allocation6 + $0x1], 1 }
 0x124   :  { %325 = vsyncpa [#allocation4], 1 }
 0x125   :  { %327 = vsyncpa [#allocation4 + $0x1], 1 }

</bundles_post_ra>
